<compile_context>
chip_gen: v7x
topology: tpu7x:2x2x1
jax: 0.10.0
libtpu: 0.0.40
codegen_flags: <defaults>
</compile_context>

<pallas_src>
import jax
import jax.numpy as jnp
from jax import lax
from jax.experimental import pallas as pl
from jax.experimental.pallas import tpu as pltpu

NUM_CLASSES = 2  # logits per sub-model

_LANE = 128
_SUBLANE = 8
# Budget for the double-buffered f32 input tiles of the K-tiled fallback.
# Conservative for every generation (v7x scoped-VMEM default is 32 MiB).
_VMEM_TILE_BUDGET = 16 * 1024 * 1024


def _round_up(x, m):
    return (x + m - 1) // m * m


# ----------------------------------------------------------------------------
# Kernels
# ----------------------------------------------------------------------------
def _ensemble_kernel_single(x_ref, wt_ref, b_ref, o_ref):
    """Gridless fast path: out = x @ W_T.T + b in one MXU call."""
    o_ref[...] = lax.dot_general(
        x_ref[...], wt_ref[...],
        dimension_numbers=(((1,), (1,)), ((), ())),   # contract lane-dense D
        preferred_element_type=jnp.float32) + b_ref[...]


def _ensemble_kernel_tiled(x_ref, wt_ref, b_ref, o_ref):
    """One K-slice of out = x @ W_T.T + b; f32 accumulation in resident o_ref."""
    k = pl.program_id(0)

    @pl.when(k == 0)
    def _():
        # Fold the bias into the accumulator init (output block is resident
        # across the whole reduction axis).
        o_ref[...] = jnp.broadcast_to(b_ref[...], o_ref.shape)

    o_ref[...] += lax.dot_general(
        x_ref[...], wt_ref[...],
        dimension_numbers=(((1,), (1,)), ((), ())),
        preferred_element_type=jnp.float32)


# ----------------------------------------------------------------------------
# Parameter prep (init-time, not in the per-call path)
# ----------------------------------------------------------------------------
def make_ensemble_params(wv, bv, wr, br):
    """One-time fold of the two linear heads into one TRANSPOSED head.

    Exact because the synthetic sub-models are linear:
        ((x@Wv + bv) + (x@Wr + br)) / 2 == x @ (0.5*(Wv+Wr)) + 0.5*(bv+br)

    Returns:
      w_ens_t: (NUM_CLASSES, D) float32 — D on the lane (fast) axis.
      b_ens:   (1, NUM_CLASSES) float32.
    """
    w_ens_t = jnp.transpose((0.5 * (wv + wr)).astype(jnp.float32))
    b_ens = (0.5 * (bv + br)).astype(jnp.float32).reshape(1, -1)
    return w_ens_t, b_ens


def _k_tiling(n, c, d):
    """Pick (tk, nk): tk multiple of 128, minimal nk under the VMEM budget."""
    rows = _round_up(n, _SUBLANE) + _round_up(c, _SUBLANE)
    # double-buffered f32 input tiles: 2 bufs * 4 B * rows * tk <= budget
    tk_budget = max(_LANE,
                    (_VMEM_TILE_BUDGET // (2 * 4 * rows)) // _LANE * _LANE)
    d128 = _round_up(d, _LANE)
    if d128 <= tk_budget:
        return d, 1                        # whole-D, gridless fast path
    nk = -(-d128 // tk_budget)             # minimal number of grid steps
    tk = _round_up(-(-d // nk), _LANE)     # even split, lane-aligned
    return tk, nk


# ----------------------------------------------------------------------------
# Forward
# ----------------------------------------------------------------------------
@jax.jit
def ensemble_forward(x_nchw, w_ens_t, b_ens):
    """x_nchw: (N, C, H, W) float32.  Returns (N, NUM_CLASSES) float32."""
    n = x_nchw.shape[0]
    c, d = w_ens_t.shape
    x_flat = x_nchw.reshape(n, d).astype(jnp.float32)

    tk, nk = _k_tiling(n, c, d)            # static at trace time

    if nk == 1:
        # One DMA + one MXU matmul + bias add. Full-array blocks (legal even
        # when not (8,128)-aligned), no grid, no accumulator RMW, no padding.
        return pl.pallas_call(
            _ensemble_kernel_single,
            out_shape=jax.ShapeDtypeStruct((n, c), jnp.float32),
        )(x_flat, w_ens_t, b_ens)

    # Large-D fallback: K-tiled reduction with resident f32 accumulator.
    d_pad = tk * nk
    if d_pad != d:
        # < 128*nk zero columns; zeros contribute nothing to the dot.
        # TODO(synk): hoist the W zero-pad to init time for huge-D callers.
        x_flat = jnp.pad(x_flat, ((0, 0), (0, d_pad - d)))
        w_ens_t = jnp.pad(w_ens_t, ((0, 0), (0, d_pad - d)))

    return pl.pallas_call(
        _ensemble_kernel_tiled,
        out_shape=jax.ShapeDtypeStruct((n, c), jnp.float32),
        grid=(nk,),
        in_specs=[
            # x: true batch dim, lane-aligned K tile.
            pl.BlockSpec((n, tk), lambda k: (0, k)),
            # W_T: true class dim, lane-dense K tile.
            pl.BlockSpec((c, tk), lambda k: (0, k)),
            # bias: single (1, c) row, broadcast inside the kernel.
            pl.BlockSpec((1, c), lambda k: (0, 0)),
        ],
        # Output block identical across the reduction axis -> resident f32
        # accumulator in VMEM.
        out_specs=pl.BlockSpec((n, c), lambda k: (0, 0)),
        compiler_params=pltpu.CompilerParams(
            dimension_semantics=("arbitrary",)),   # reduction axis
    )(x_flat, w_ens_t, b_ens)


if __name__ == "__main__":
    key = jax.random.PRNGKey(0)
    k_x, k_wv, k_bv, k_wr, k_br = jax.random.split(key, 5)

    # Small NCHW input consistent with an image classifier: (2, 4, 16, 16)
    N, C, H, W = 2, 4, 16, 16
    D = C * H * W
    x = jax.random.normal(k_x, (N, C, H, W), dtype=jnp.float32)

    # Deterministic synthetic sub-model parameters (linear classifier heads).
    wv = jax.random.normal(k_wv, (D, NUM_CLASSES), dtype=jnp.float32) * 0.02
    bv = jax.random.normal(k_bv, (NUM_CLASSES,), dtype=jnp.float32) * 0.01
    wr = jax.random.normal(k_wr, (D, NUM_CLASSES), dtype=jnp.float32) * 0.02
    br = jax.random.normal(k_br, (NUM_CLASSES,), dtype=jnp.float32) * 0.01

    # One-time parameter prep (hoisted out of the per-call path).
    w_ens_t, b_ens = jax.block_until_ready(make_ensemble_params(wv, bv, wr, br))

    out = jax.block_until_ready(ensemble_forward(x, w_ens_t, b_ens))

    # Pure-JAX reference of the original ensemble semantics (full precision).
    x_flat = x.reshape(N, D)
    hi = jax.lax.Precision.HIGHEST
    ref = ((jnp.dot(x_flat, wv, precision=hi) + bv)
           + (jnp.dot(x_flat, wr, precision=hi) + br)) / 2.0
    assert out.shape == (N, NUM_CLASSES)
    assert jnp.allclose(out, ref, atol=1e-4, rtol=1e-4)

    print("KERNEL_OK")
</pallas_src>

<mosaic_0001>
module attributes {stable_mosaic.version = 11 : i64} {
  func.func @_ensemble_kernel_single(%arg0: memref<2x1024xf32, #tpu.memory_space<vmem>>, %arg1: memref<2x1024xf32, #tpu.memory_space<vmem>>, %arg2: memref<1x2xf32, #tpu.memory_space<vmem>>, %arg3: memref<2x2xf32, #tpu.memory_space<vmem>>) attributes {dimension_semantics = [], scalar_prefetch = 0 : i64, scratch_operands = 0 : i64, tpu.core_type = #tpu.core_type<tc>} {
    %c0 = arith.constant 0 : index
    %c0_0 = arith.constant 0 : index
    %0 = vector.load %arg0[%c0, %c0_0] : memref<2x1024xf32, #tpu.memory_space<vmem>>, vector<2x1024xf32>
    %c0_1 = arith.constant 0 : index
    %c0_2 = arith.constant 0 : index
    %1 = vector.load %arg1[%c0_1, %c0_2] : memref<2x1024xf32, #tpu.memory_space<vmem>>, vector<2x1024xf32>
    %cst = arith.constant dense<0.000000e+00> : vector<2x2xf32>
    %2 = tpu.matmul %0, %1, %cst {dimension_numbers = #tpu.dot_dimension_numbers<[1], [1], [0], [0], [0, 0, 1, 0], [], []>} : vector<2x1024xf32>, vector<2x1024xf32>, vector<2x2xf32> -> vector<2x2xf32>
    %c0_3 = arith.constant 0 : index
    %c0_4 = arith.constant 0 : index
    %3 = vector.load %arg2[%c0_3, %c0_4] : memref<1x2xf32, #tpu.memory_space<vmem>>, vector<1x2xf32>
    %4 = vector.broadcast %3 : vector<1x2xf32> to vector<2x2xf32>
    %5 = arith.addf %2, %4 : vector<2x2xf32>
    %c0_5 = arith.constant 0 : index
    %c0_6 = arith.constant 0 : index
    %6 = vector.load %arg3[%c0_5, %c0_6] : memref<2x2xf32, #tpu.memory_space<vmem>>, vector<2x2xf32>
    tpu.vector_store %arg3[%c0_5, %c0_6], %5 {strides = array<i32>} : memref<2x2xf32, #tpu.memory_space<vmem>>, vector<2x2xf32>,
    return
  }
}

</mosaic_0001>

<bundles_post_ra>
// kernel: ensemble_forward.1
= control target key start
LH: loop header
LB: loop body
LE: loop exit
PB: predicated region body
PF: predicated region fallthrough
CT: control target
= control target key end

     0   :  { %v32_v0 = vlaneseq  ;;  %v447_v1 = vmov 1983009808   ;;  %s496_s0 = inlined_call_operand.vmem [shape: f32[2,1024], index: 0, kind: input, shape index: {}]   ;;  %s497_s1 = inlined_call_operand.vmem [shape: f32[2,1024], index: 1, kind: input, shape index: {}]   ;;  %s498_s2 = inlined_call_operand.vmem [shape: f32[1,2], index: 2, kind: input, shape index: {}]   ;;  %s499_s3 = inlined_call_operand.hbm [shape: f32[2,2], index: 3, kind: output, shape index: {}]  }
   0x1   :  { %v30_v2 = vunpack.c.l.s4 %v447_v1 }
   0x2   :  { %8 = vsyncpa [#allocation3], 0  ;;  %v17_v3 = vld [vmem:[%s497_s1] sm:$0xff]  ;;  %v33_v4 = vshrl.u32 %v32_v0, 7  ;;  %v18_v6 = vld [vmem:[%s497_s1 + $0x8] sm:$0xff]  ;;  %s448_s20 = smov [#allocation2]  }
   0x3   :  { %v31_v5 = vunpack.c.0.s8 %v30_v2  ;;  %v15_v7 = vld [vmem:[%s496_s0] sm:$0xff]  ;;  %v16_v8 = vld [vmem:[%s496_s0 + $0x8] sm:$0xff]  ;;  %v72_v9 = vcombine.high %v17_v3, %v17_v3  ;;  %v89_v10 = vcombine.high %v18_v6, %v18_v6  ;;  %s402_s21 = sshll.u32 %s448_s20, 4  ;;  %vm394_vm0 = vcmask 9216   ;;  %s403_s21 = int_to_ptr.vmem [resolvable:$true] %s402_s21 }
   0x4   :  { %v28_v11 = vcombine.high %v15_v7, %v15_v7  ;;  %v45_v12 = vcombine.high %v16_v8, %v16_v8  ;;  %v410_v30 = vld [vmem:[%s498_s2] ss:$0 sm:$0xff]  ;;  %s423_s22 = scalar_lea.vmem %s403_s21, 32  ;;  %p428_p1 = scmp.lt.s32.totalorder %s403_s21, %s403_s21 }
   0x5   :  { %v34_v13 = vsub.s32 %v31_v5, %v33_v4  ;;  %p424_p0 = scmp.ne.s32.totalorder %s403_s21, %s423_s22  ;;  %p429_p2 = scmp.lt.s32.totalorder %s423_s22, %s423_s22 }
   0x7   :  { %v79_v14 = vrot.slane %v17_v3, %v34_v13  ;;  %v96_v15 = vrot.slane %v18_v6, %v34_v13  ;;  %v35_v16 = vrot.slane %v15_v7, %v34_v13  ;;  %v52_v17 = vrot.slane %v16_v8, %v34_v13  ;;  %p430_p3 = por %p429_p2, %p428_p1 }
   0x8   :  { %v86_v18 = vrot.slane %v72_v9, %v34_v13  ;;  %v103_v19 = vrot.slane %v89_v10, %v34_v13  ;;  %v42_v20 = vrot.slane %v28_v11, %v34_v13  ;;  %v59_v21 = vrot.slane %v45_v12, %v34_v13 }
   0x9   :  { %v87_v22 = vcombine.high %v79_v14, %v79_v14  ;;  %v104_v23 = vcombine.high %v96_v15, %v96_v15  ;;  %v43_v24 = vcombine.high %v35_v16, %v35_v16  ;;  %v60_v25 = vcombine.high %v52_v17, %v52_v17  ;;  %p431_p4 = pnand %p430_p3, %p424_p0 }
   0xa   :  { %v88_v26 = vcombine.high %v86_v18, %v86_v18  ;;  %v105_v27 = vcombine.high %v103_v19, %v103_v19  ;;  %v44_v28 = vcombine.high %v42_v20, %v42_v20  ;;  %v61_v29 = vcombine.high %v59_v21, %v59_v21 }
   0xb   :  { %114 = vmatprep.subr.mxu1 %v87_v22  ;;  %254 = vmatprep.subr.mxu0 %v104_v23 }
   0xc   :  { %115 = vmatpush1.xpose.msra.mxu1 %v79_v14  ;;  %255 = vmatpush1.xpose.msra.mxu0 %v96_v15 }
   0xd   :  { %178 = vmatprep.mubr.f32.mxu1 %v43_v24  ;;  %318 = vmatprep.mubr.f32.mxu0 %v60_v25 }
   0xe   :  { %184 = vmatprep.subr.mxu1 %v88_v26  ;;  %324 = vmatprep.subr.mxu0 %v105_v27 }
   0xf   :  { %179 = vmatmul.mubr.f32.vlgmr.msra.gmra.mrb[0].mxu1 %v35_v16  ;;  %319 = vmatmul.mubr.f32.vlgmr.msra.gmra.mrb[0].mxu0 %v52_v17 }
  0x10   :  { %185 = vmatpush1.xpose.msra.mxu1 %v86_v18  ;;  %325 = vmatpush1.xpose.msra.mxu0 %v103_v19 }
  0x11   :  { %248 = vmatprep.mubr.f32.mxu1 %v44_v28  ;;  %388 = vmatprep.mubr.f32.mxu0 %v61_v29 }
  0x17   :  { %249 = vmatmul.mubr.f32.vlgmr.msra.gmra.mrb[0].mxu1 %v42_v20  ;;  %389 = vmatmul.mubr.f32.vlgmr.msra.gmra.mrb[0].mxu0 %v59_v21 }
  0xea   :  { %v250_v31 = vpop.f32.mrb[0].mxu1  ;;  %v390_v32 = vpop.f32.mrb[0].mxu0 }
  0xeb   :  { %v411_v33 = vadd.f32 %v410_v30, %v250_v31  ;;  %v252_v34 = vpop.f32.mrb[1].mxu1  ;;  %v392_v35 = vpop.f32.mrb[1].mxu0 }
  0xed   :  { %v412_v36 = vadd.f32 %v411_v33, %v390_v32 }
  0xef   :  { %395 = vst.msk [vmem:[#allocation2] sm:$0x3] %vm394_vm0, %v412_v36 }
  0xf0   :  { %434 = shalt.err (!%p431_p4)
}
  0xf1   :  { %s435_s24 = scalar_lea.hbm %s499_s3, 32 }
  0xf2   :  { %p436_p5 = scmp.ne.s32.totalorder %s499_s3, %s435_s24  ;;  %p439_p6 = scmp.lt.u32.totalorder %s435_s24, %s499_s3 }
  0xf4   :  { %p441_p7 = pnand %p439_p6, %p436_p5 }
  0xf6   :  { %444 = shalt.err (!%p441_p7)
}
  0xf7   :  { %405 = dma.vmem_to_hbm [thread:$0]  %s403_s21, 32, %s499_s3, [#allocation3]  }
  0xf8   :  { %445 = dma.done.wait [#allocation3], 32  }
  0xf9   :  { %446 = vsyncadd [#allocation3], 4294967264 }
  0xfa   :  { %409 = vsyncpa [#allocation3], 1 }

</bundles_post_ra>
